<compile_context>
chip_gen: v7x
topology: tpu7x:2x2x1
jax: 0.10.0
libtpu: 0.0.40
codegen_flags: <defaults>
</compile_context>

<pallas_src>
import functools

import jax
import jax.numpy as jnp
from jax.experimental import pallas as pl
from jax.experimental.pallas import tpu as pltpu

EPS = 1e-5                      # PyTorch LayerNorm default
D_IN = 28 * 28                  # 784
H1, H2 = 128, 64
D_OUT, D_OUT_PAD = 10, 128      # lane-dense padded output


def _layernorm(h, gamma, beta):
    # Single-pass statistics in f32: var = max(E[h^2] - mu^2, 0), 1/H constant.
    inv_h = 1.0 / h.shape[-1]
    mu = jnp.sum(h, axis=-1, keepdims=True) * inv_h
    ex2 = jnp.sum(h * h, axis=-1, keepdims=True) * inv_h
    var = jnp.maximum(ex2 - mu * mu, 0.0)
    return (h - mu) * jax.lax.rsqrt(var + EPS) * gamma + beta


def mlp_norm_kernel(x_ref,
                    w1_ref, b1_ref, g1_ref, be1_ref,
                    w2_ref, b2_ref, g2_ref, be2_ref,
                    w3_ref, b3_ref,
                    o_ref):
    # fc1: x streamed as f32, cast to bf16 on the VPU just before the MXU;
    # f32 accumulation; then LayerNorm(128) + ReLU in f32.
    x = x_ref[...].astype(jnp.bfloat16)
    h = jnp.dot(x, w1_ref[...], preferred_element_type=jnp.float32) + b1_ref[...]
    h = _layernorm(h, g1_ref[...], be1_ref[...])
    h = jnp.maximum(h, 0.0)

    # fc2 + LayerNorm(64) + ReLU
    h = jnp.dot(h.astype(jnp.bfloat16), w2_ref[...],
                preferred_element_type=jnp.float32) + b2_ref[...]
    h = _layernorm(h, g2_ref[...], be2_ref[...])
    h = jnp.maximum(h, 0.0)

    # fc3 (output padded to 128 lanes -> unmasked lane-dense stores)
    out = jnp.dot(h.astype(jnp.bfloat16), w3_ref[...],
                  preferred_element_type=jnp.float32) + b3_ref[...]
    o_ref[...] = out.astype(o_ref.dtype)


def prepare_params(params):
    """One-time weight prep (cast matmul operands to bf16, lane-pad fc3)."""
    (w1, b1, g1, be1, w2, b2, g2, be2, w3, b3) = params
    w1p = w1.astype(jnp.bfloat16)                                     # (784, 128)
    w2p = w2.astype(jnp.bfloat16)                                     # (128, 64)
    w3p = jnp.pad(w3, ((0, 0), (0, D_OUT_PAD - D_OUT))).astype(jnp.bfloat16)
    b3p = jnp.pad(b3, ((0, 0), (0, D_OUT_PAD - D_OUT)))
    return (w1p, b1, g1, be1, w2p, b2, g2, be2, w3p, b3p)


def _choose_batch_tile(B, max_tile=1024):
    # ~ceil(B/2) rounded up to a multiple of 8, capped at max_tile:
    #   * small/odd B  -> tiny tile, no wasted batch padding (mem-bound kernel)
    #   * medium B     -> 2 tiles so v7x's two TensorCores both get work
    #   * large B      -> 1024-row tiles (per-step pipeline overhead amortized)
    half = -(-B // 2)
    tile = -(-half // 8) * 8
    return max(8, min(max_tile, tile))


@functools.partial(jax.jit, static_argnames=("batch_tile",))
def _mlp_norm_pallas(x, prepared, *, batch_tile):
    (w1p, b1, g1, be1, w2p, b2, g2, be2, w3p, b3p) = prepared
    B = x.shape[0]
    B_pad = pl.cdiv(B, batch_tile) * batch_tile
    if B_pad != B:
        x = jnp.pad(x, ((0, B_pad - B), (0, 0)))

    grid = (B_pad // batch_tile,)

    def full_block(shape):
        # Small parameter arrays: whole array resident in VMEM every grid step.
        return pl.BlockSpec(shape, lambda i: tuple(0 for _ in shape))

    # Double-buffered f32 x tile + f32 out tile, plus weights/intermediates.
    vmem_limit = 32 * 1024 * 1024

    out = pl.pallas_call(
        mlp_norm_kernel,
        out_shape=jax.ShapeDtypeStruct((B_pad, D_OUT_PAD), jnp.float32),
        grid=grid,
        in_specs=[
            pl.BlockSpec((batch_tile, D_IN), lambda i: (i, 0)),       # x tile (f32)
            full_block((D_IN, H1)), full_block((1, H1)),              # fc1 w, b
            full_block((1, H1)), full_block((1, H1)),                 # norm1 g, b
            full_block((H1, H2)), full_block((1, H2)),                # fc2 w, b
            full_block((1, H2)), full_block((1, H2)),                 # norm2 g, b
            full_block((H2, D_OUT_PAD)), full_block((1, D_OUT_PAD)),  # fc3 w, b
        ],
        out_specs=pl.BlockSpec((batch_tile, D_OUT_PAD), lambda i: (i, 0)),
        compiler_params=pltpu.CompilerParams(
            dimension_semantics=("parallel",),
            vmem_limit_bytes=vmem_limit),
    )(x, w1p, b1, g1, be1, w2p, b2, g2, be2, w3p, b3p)

    # Drop batch padding and the lane padding of the logits.
    return out[:B, :D_OUT]


def mlp_norm_forward(x_nchw, prepared_params, *, batch_tile=None):
    """x_nchw: [B, 1, 28, 28] float32. Returns ([B, 10] float32, None)."""
    B = x_nchw.shape[0]
    x = x_nchw.reshape(B, D_IN)                    # free reshape, stays f32
    if batch_tile is None:
        batch_tile = _choose_batch_tile(B)
    out = _mlp_norm_pallas(x, prepared_params, batch_tile=batch_tile)
    return out, None


def init_params(key):
    """Deterministic synthetic parameters matching the module's shapes."""
    ks = jax.random.split(key, 3)

    def lin(k, fan_in, fan_out):
        kw, kb = jax.random.split(k)
        bound = 1.0 / jnp.sqrt(fan_in)
        w = jax.random.uniform(kw, (fan_in, fan_out), jnp.float32, -bound, bound)
        b = jax.random.uniform(kb, (1, fan_out), jnp.float32, -bound, bound)
        return w, b

    w1, b1 = lin(ks[0], D_IN, H1)
    w2, b2 = lin(ks[1], H1, H2)
    w3, b3 = lin(ks[2], H2, D_OUT)
    # LayerNorm affine params: gamma=1, beta=0 (PyTorch default init)
    g1, be1 = jnp.ones((1, H1), jnp.float32), jnp.zeros((1, H1), jnp.float32)
    g2, be2 = jnp.ones((1, H2), jnp.float32), jnp.zeros((1, H2), jnp.float32)
    return (w1, b1, g1, be1, w2, b2, g2, be2, w3, b3)


def reference_forward(x_nchw, params):
    """Pure-JAX reference mirroring the kernel numerics (bf16 operands, f32 acc).
    Note: vs. a pure-f32 PyTorch nn.Linear the bf16 MXU operands introduce
    ~1e-3 relative error; the self-test uses the bf16-mirroring reference."""
    (w1, b1, g1, be1, w2, b2, g2, be2, w3, b3) = params
    x = x_nchw.reshape(x_nchw.shape[0], -1)

    def bf16_dot(a, w):
        return jnp.dot(a.astype(jnp.bfloat16), w.astype(jnp.bfloat16),
                       preferred_element_type=jnp.float32)

    h = bf16_dot(x, w1) + b1
    h = _layernorm(h, g1, be1)
    h = jnp.maximum(h, 0.0)
    h = bf16_dot(h, w2) + b2
    h = _layernorm(h, g2, be2)
    h = jnp.maximum(h, 0.0)
    return bf16_dot(h, w3) + b3


if __name__ == "__main__":
    key = jax.random.PRNGKey(0)
    kx, kp = jax.random.split(key)

    B = 8
    x = jax.random.normal(kx, (B, 1, 28, 28), jnp.float32)  # NCHW input
    params = init_params(kp)
    prepared = prepare_params(params)                        # one-time weight prep

    out, aux = mlp_norm_forward(x, prepared)
    out = jax.block_until_ready(out)
    assert out.shape == (B, D_OUT) and aux is None

    ref = reference_forward(x, params)
    assert jnp.allclose(out, ref, atol=2e-3, rtol=2e-3), "mismatch vs reference"

    print("KERNEL_OK")
</pallas_src>

<mosaic_0001>
module attributes {stable_mosaic.version = 11 : i64} {
  func.func @mlp_norm_kernel(%arg0: i32, %arg1: memref<8x784xf32, #tpu.memory_space<vmem>>, %arg2: memref<784x128xbf16, #tpu.memory_space<vmem>>, %arg3: memref<1x128xf32, #tpu.memory_space<vmem>>, %arg4: memref<1x128xf32, #tpu.memory_space<vmem>>, %arg5: memref<1x128xf32, #tpu.memory_space<vmem>>, %arg6: memref<128x64xbf16, #tpu.memory_space<vmem>>, %arg7: memref<1x64xf32, #tpu.memory_space<vmem>>, %arg8: memref<1x64xf32, #tpu.memory_space<vmem>>, %arg9: memref<1x64xf32, #tpu.memory_space<vmem>>, %arg10: memref<64x128xbf16, #tpu.memory_space<vmem>>, %arg11: memref<1x128xf32, #tpu.memory_space<vmem>>, %arg12: memref<8x128xf32, #tpu.memory_space<vmem>>) attributes {dimension_semantics = [#tpu.dimension_semantics<parallel>], iteration_bounds = array<i64: 1>, scalar_prefetch = 0 : i64, scratch_operands = 0 : i64, tpu.core_type = #tpu.core_type<tc>, window_params = [{transform_indices = @transform_0, window_bounds = array<i64: 8, 784>}, {pipeline_mode = #tpu.pipeline_mode<synchronous>, transform_indices = @transform_1, window_bounds = array<i64: 784, 128>}, {pipeline_mode = #tpu.pipeline_mode<synchronous>, transform_indices = @transform_2, window_bounds = array<i64: 1, 128>}, {pipeline_mode = #tpu.pipeline_mode<synchronous>, transform_indices = @transform_3, window_bounds = array<i64: 1, 128>}, {pipeline_mode = #tpu.pipeline_mode<synchronous>, transform_indices = @transform_4, window_bounds = array<i64: 1, 128>}, {pipeline_mode = #tpu.pipeline_mode<synchronous>, transform_indices = @transform_5, window_bounds = array<i64: 128, 64>}, {pipeline_mode = #tpu.pipeline_mode<synchronous>, transform_indices = @transform_6, window_bounds = array<i64: 1, 64>}, {pipeline_mode = #tpu.pipeline_mode<synchronous>, transform_indices = @transform_7, window_bounds = array<i64: 1, 64>}, {pipeline_mode = #tpu.pipeline_mode<synchronous>, transform_indices = @transform_8, window_bounds = array<i64: 1, 64>}, {pipeline_mode = #tpu.pipeline_mode<synchronous>, transform_indices = @transform_9, window_bounds = array<i64: 64, 128>}, {pipeline_mode = #tpu.pipeline_mode<synchronous>, transform_indices = @transform_10, window_bounds = array<i64: 1, 128>}, {transform_indices = @transform_11, window_bounds = array<i64: 8, 128>}]} {
    %c0 = arith.constant 0 : index
    %c0_0 = arith.constant 0 : index
    %0 = vector.load %arg1[%c0, %c0_0] : memref<8x784xf32, #tpu.memory_space<vmem>>, vector<8x784xf32>
    %1 = arith.truncf %0 : vector<8x784xf32> to vector<8x784xbf16>
    %c0_1 = arith.constant 0 : index
    %c0_2 = arith.constant 0 : index
    %2 = vector.load %arg2[%c0_1, %c0_2] : memref<784x128xbf16, #tpu.memory_space<vmem>>, vector<784x128xbf16>
    %cst = arith.constant dense<0.000000e+00> : vector<8x128xf32>
    %3 = tpu.matmul %1, %2, %cst {dimension_numbers = #tpu.dot_dimension_numbers<[1], [0], [0], [1], [0, 0, 1, 1], [], []>} : vector<8x784xbf16>, vector<784x128xbf16>, vector<8x128xf32> -> vector<8x128xf32>
    %c0_3 = arith.constant 0 : index
    %c0_4 = arith.constant 0 : index
    %4 = vector.load %arg3[%c0_3, %c0_4] : memref<1x128xf32, #tpu.memory_space<vmem>>, vector<1x128xf32>
    %5 = vector.broadcast %4 : vector<1x128xf32> to vector<8x128xf32>
    %6 = arith.addf %3, %5 : vector<8x128xf32>
    %c0_5 = arith.constant 0 : index
    %c0_6 = arith.constant 0 : index
    %7 = vector.load %arg4[%c0_5, %c0_6] : memref<1x128xf32, #tpu.memory_space<vmem>>, vector<1x128xf32>
    %c0_7 = arith.constant 0 : index
    %c0_8 = arith.constant 0 : index
    %8 = vector.load %arg5[%c0_7, %c0_8] : memref<1x128xf32, #tpu.memory_space<vmem>>, vector<1x128xf32>
    %cst_9 = arith.constant dense<0.000000e+00> : vector<8xf32>
    %9 = vector.multi_reduction <add>, %6, %cst_9 [1] : vector<8x128xf32> to vector<8xf32>
    %10 = vector.shape_cast %9 : vector<8xf32> to vector<8x1xf32>
    %cst_10 = arith.constant 7.812500e-03 : f32
    %11 = vector.broadcast %cst_10 : f32 to vector<8x1xf32>
    %12 = arith.mulf %10, %11 : vector<8x1xf32>
    %13 = arith.mulf %6, %6 : vector<8x128xf32>
    %cst_11 = arith.constant dense<0.000000e+00> : vector<8xf32>
    %14 = vector.multi_reduction <add>, %13, %cst_11 [1] : vector<8x128xf32> to vector<8xf32>
    %15 = vector.shape_cast %14 : vector<8xf32> to vector<8x1xf32>
    %cst_12 = arith.constant 7.812500e-03 : f32
    %16 = vector.broadcast %cst_12 : f32 to vector<8x1xf32>
    %17 = arith.mulf %15, %16 : vector<8x1xf32>
    %18 = arith.mulf %12, %12 : vector<8x1xf32>
    %19 = arith.subf %17, %18 : vector<8x1xf32>
    %cst_13 = arith.constant 0.000000e+00 : f32
    %20 = vector.broadcast %cst_13 : f32 to vector<8x1xf32>
    %21 = arith.maximumf %19, %20 : vector<8x1xf32>
    %22 = vector.broadcast %12 : vector<8x1xf32> to vector<8x128xf32>
    %23 = arith.subf %6, %22 : vector<8x128xf32>
    %cst_14 = arith.constant 9.99999974E-6 : f32
    %24 = vector.broadcast %cst_14 : f32 to vector<8x1xf32>
    %25 = arith.addf %21, %24 : vector<8x1xf32>
    %26 = math.rsqrt %25 : vector<8x1xf32>
    %27 = vector.broadcast %26 : vector<8x1xf32> to vector<8x128xf32>
    %28 = arith.mulf %23, %27 : vector<8x128xf32>
    %29 = vector.broadcast %7 : vector<1x128xf32> to vector<8x128xf32>
    %30 = arith.mulf %28, %29 : vector<8x128xf32>
    %31 = vector.broadcast %8 : vector<1x128xf32> to vector<8x128xf32>
    %32 = arith.addf %30, %31 : vector<8x128xf32>
    %cst_15 = arith.constant 0.000000e+00 : f32
    %33 = vector.broadcast %cst_15 : f32 to vector<8x128xf32>
    %34 = arith.maximumf %32, %33 : vector<8x128xf32>
    %35 = arith.truncf %34 : vector<8x128xf32> to vector<8x128xbf16>
    %c0_16 = arith.constant 0 : index
    %c0_17 = arith.constant 0 : index
    %36 = vector.load %arg6[%c0_16, %c0_17] : memref<128x64xbf16, #tpu.memory_space<vmem>>, vector<128x64xbf16>
    %cst_18 = arith.constant dense<0.000000e+00> : vector<8x64xf32>
    %37 = tpu.matmul %35, %36, %cst_18 {dimension_numbers = #tpu.dot_dimension_numbers<[1], [0], [0], [1], [0, 0, 1, 1], [], []>} : vector<8x128xbf16>, vector<128x64xbf16>, vector<8x64xf32> -> vector<8x64xf32>
    %c0_19 = arith.constant 0 : index
    %c0_20 = arith.constant 0 : index
    %38 = vector.load %arg7[%c0_19, %c0_20] : memref<1x64xf32, #tpu.memory_space<vmem>>, vector<1x64xf32>
    %39 = vector.broadcast %38 : vector<1x64xf32> to vector<8x64xf32>
    %40 = arith.addf %37, %39 : vector<8x64xf32>
    %c0_21 = arith.constant 0 : index
    %c0_22 = arith.constant 0 : index
    %41 = vector.load %arg8[%c0_21, %c0_22] : memref<1x64xf32, #tpu.memory_space<vmem>>, vector<1x64xf32>
    %c0_23 = arith.constant 0 : index
    %c0_24 = arith.constant 0 : index
    %42 = vector.load %arg9[%c0_23, %c0_24] : memref<1x64xf32, #tpu.memory_space<vmem>>, vector<1x64xf32>
    %cst_25 = arith.constant dense<0.000000e+00> : vector<8xf32>
    %43 = vector.multi_reduction <add>, %40, %cst_25 [1] : vector<8x64xf32> to vector<8xf32>
    %44 = vector.shape_cast %43 : vector<8xf32> to vector<8x1xf32>
    %cst_26 = arith.constant 1.562500e-02 : f32
    %45 = vector.broadcast %cst_26 : f32 to vector<8x1xf32>
    %46 = arith.mulf %44, %45 : vector<8x1xf32>
    %47 = arith.mulf %40, %40 : vector<8x64xf32>
    %cst_27 = arith.constant dense<0.000000e+00> : vector<8xf32>
    %48 = vector.multi_reduction <add>, %47, %cst_27 [1] : vector<8x64xf32> to vector<8xf32>
    %49 = vector.shape_cast %48 : vector<8xf32> to vector<8x1xf32>
    %cst_28 = arith.constant 1.562500e-02 : f32
    %50 = vector.broadcast %cst_28 : f32 to vector<8x1xf32>
    %51 = arith.mulf %49, %50 : vector<8x1xf32>
    %52 = arith.mulf %46, %46 : vector<8x1xf32>
    %53 = arith.subf %51, %52 : vector<8x1xf32>
    %cst_29 = arith.constant 0.000000e+00 : f32
    %54 = vector.broadcast %cst_29 : f32 to vector<8x1xf32>
    %55 = arith.maximumf %53, %54 : vector<8x1xf32>
    %56 = vector.broadcast %46 : vector<8x1xf32> to vector<8x64xf32>
    %57 = arith.subf %40, %56 : vector<8x64xf32>
    %cst_30 = arith.constant 9.99999974E-6 : f32
    %58 = vector.broadcast %cst_30 : f32 to vector<8x1xf32>
    %59 = arith.addf %55, %58 : vector<8x1xf32>
    %60 = math.rsqrt %59 : vector<8x1xf32>
    %61 = vector.broadcast %60 : vector<8x1xf32> to vector<8x64xf32>
    %62 = arith.mulf %57, %61 : vector<8x64xf32>
    %63 = vector.broadcast %41 : vector<1x64xf32> to vector<8x64xf32>
    %64 = arith.mulf %62, %63 : vector<8x64xf32>
    %65 = vector.broadcast %42 : vector<1x64xf32> to vector<8x64xf32>
    %66 = arith.addf %64, %65 : vector<8x64xf32>
    %cst_31 = arith.constant 0.000000e+00 : f32
    %67 = vector.broadcast %cst_31 : f32 to vector<8x64xf32>
    %68 = arith.maximumf %66, %67 : vector<8x64xf32>
    %69 = arith.truncf %68 : vector<8x64xf32> to vector<8x64xbf16>
    %c0_32 = arith.constant 0 : index
    %c0_33 = arith.constant 0 : index
    %70 = vector.load %arg10[%c0_32, %c0_33] : memref<64x128xbf16, #tpu.memory_space<vmem>>, vector<64x128xbf16>
    %cst_34 = arith.constant dense<0.000000e+00> : vector<8x128xf32>
    %71 = tpu.matmul %69, %70, %cst_34 {dimension_numbers = #tpu.dot_dimension_numbers<[1], [0], [0], [1], [0, 0, 1, 1], [], []>} : vector<8x64xbf16>, vector<64x128xbf16>, vector<8x128xf32> -> vector<8x128xf32>
    %c0_35 = arith.constant 0 : index
    %c0_36 = arith.constant 0 : index
    %72 = vector.load %arg11[%c0_35, %c0_36] : memref<1x128xf32, #tpu.memory_space<vmem>>, vector<1x128xf32>
    %73 = vector.broadcast %72 : vector<1x128xf32> to vector<8x128xf32>
    %74 = arith.addf %71, %73 : vector<8x128xf32>
    %c0_37 = arith.constant 0 : index
    %c0_38 = arith.constant 0 : index
    %75 = vector.load %arg12[%c0_37, %c0_38] : memref<8x128xf32, #tpu.memory_space<vmem>>, vector<8x128xf32>
    tpu.vector_store %arg12[%c0_37, %c0_38], %74 {strides = array<i32>} : memref<8x128xf32, #tpu.memory_space<vmem>>, vector<8x128xf32>,
    return
  }
  func.func @transform_0(%arg0: i32) -> (i32, i32) {
    %c0_i32 = arith.constant 0 : i32
    %c0_i32_0 = arith.constant 0 : i32
    return %arg0, %c0_i32 : i32, i32
  }
  func.func @transform_1(%arg0: i32) -> (i32, i32) {
    %c0_i32 = arith.constant 0 : i32
    %c0_i32_0 = arith.constant 0 : i32
    %c0_i32_1 = arith.constant 0 : i32
    return %c0_i32, %c0_i32_0 : i32, i32
  }
  func.func @transform_2(%arg0: i32) -> (i32, i32) {
    %c0_i32 = arith.constant 0 : i32
    %c0_i32_0 = arith.constant 0 : i32
    %c0_i32_1 = arith.constant 0 : i32
    return %c0_i32, %c0_i32_0 : i32, i32
  }
  func.func @transform_3(%arg0: i32) -> (i32, i32) {
    %c0_i32 = arith.constant 0 : i32
    %c0_i32_0 = arith.constant 0 : i32
    %c0_i32_1 = arith.constant 0 : i32
    return %c0_i32, %c0_i32_0 : i32, i32
  }
  func.func @transform_4(%arg0: i32) -> (i32, i32) {
    %c0_i32 = arith.constant 0 : i32
    %c0_i32_0 = arith.constant 0 : i32
    %c0_i32_1 = arith.constant 0 : i32
    return %c0_i32, %c0_i32_0 : i32, i32
  }
  func.func @transform_5(%arg0: i32) -> (i32, i32) {
    %c0_i32 = arith.constant 0 : i32
    %c0_i32_0 = arith.constant 0 : i32
    %c0_i32_1 = arith.constant 0 : i32
    return %c0_i32, %c0_i32_0 : i32, i32
  }
  func.func @transform_6(%arg0: i32) -> (i32, i32) {
    %c0_i32 = arith.constant 0 : i32
    %c0_i32_0 = arith.constant 0 : i32
    %c0_i32_1 = arith.constant 0 : i32
    return %c0_i32, %c0_i32_0 : i32, i32
  }
  func.func @transform_7(%arg0: i32) -> (i32, i32) {
    %c0_i32 = arith.constant 0 : i32
    %c0_i32_0 = arith.constant 0 : i32
    %c0_i32_1 = arith.constant 0 : i32
    return %c0_i32, %c0_i32_0 : i32, i32
  }
  func.func @transform_8(%arg0: i32) -> (i32, i32) {
    %c0_i32 = arith.constant 0 : i32
    %c0_i32_0 = arith.constant 0 : i32
    %c0_i32_1 = arith.constant 0 : i32
    return %c0_i32, %c0_i32_0 : i32, i32
  }
  func.func @transform_9(%arg0: i32) -> (i32, i32) {
    %c0_i32 = arith.constant 0 : i32
    %c0_i32_0 = arith.constant 0 : i32
    %c0_i32_1 = arith.constant 0 : i32
    return %c0_i32, %c0_i32_0 : i32, i32
  }
  func.func @transform_10(%arg0: i32) -> (i32, i32) {
    %c0_i32 = arith.constant 0 : i32
    %c0_i32_0 = arith.constant 0 : i32
    %c0_i32_1 = arith.constant 0 : i32
    return %c0_i32, %c0_i32_0 : i32, i32
  }
  func.func @transform_11(%arg0: i32) -> (i32, i32) {
    %c0_i32 = arith.constant 0 : i32
    %c0_i32_0 = arith.constant 0 : i32
    return %arg0, %c0_i32 : i32, i32
  }
}

</mosaic_0001>

<bundles_post_ra>
// kernel: _mlp_norm_pallas.1
= control target key start
LH: loop header
LB: loop body
LE: loop exit
PB: predicated region body
PF: predicated region fallthrough
CT: control target
= control target key end

     0   :  { %16 = vsyncpa [#allocation3], 0  ;;  %s1406_s0 = inlined_call_operand.vmem [shape: f32[8,784], index: 0, kind: input, shape index: {}]   ;;  %s1407_s1 = inlined_call_operand.hbm [shape: bf16[784,128], index: 1, kind: input, shape index: {}]   ;;  %s1408_s2 = inlined_call_operand.vmem [shape: f32[1,128], index: 2, kind: input, shape index: {}]   ;;  %s1409_s3 = inlined_call_operand.vmem [shape: f32[1,128], index: 3, kind: input, shape index: {}]   ;;  %s1410_s4 = inlined_call_operand.vmem [shape: f32[1,128], index: 4, kind: input, shape index: {}]   ;;  %s1411_s5 = inlined_call_operand.vmem [shape: bf16[128,64], index: 5, kind: input, shape index: {}]   ;;  %s1412_s6 = inlined_call_operand.vmem [shape: f32[1,64], index: 6, kind: input, shape index: {}]   ;;  %s1413_s7 = inlined_call_operand.vmem [shape: f32[1,64], index: 7, kind: input, shape index: {}]   ;;  %s1414_s8 = inlined_call_operand.vmem [shape: f32[1,64], index: 8, kind: input, shape index: {}]   ;;  %s1415_s9 = inlined_call_operand.vmem [shape: bf16[64,128], index: 9, kind: input, shape index: {}]   ;;  %s1416_s10 = inlined_call_operand.vmem [shape: f32[1,128], index: 10, kind: input, shape index: {}]   ;;  %s1417_s11 = inlined_call_operand.hbm [shape: f32[8,128], index: 11, kind: output, shape index: {}]  }
   0x1   :  { %17 = vsyncpa [#allocation4], 0  ;;  %s1216_s17 = smov [#allocation2]   ;;  %s1168_s21 = scalar_lea.hbm %s1407_s1, 6272 }
   0x2   :  { %s25_s18 = sshll.u32 %s1216_s17, 4  ;;  %p1169_p0 = scmp.ne.s32.totalorder %s1407_s1, %s1168_s21  ;;  %s26_s18 = int_to_ptr.vmem [resolvable:$true] %s25_s18 }
   0x3   :  { %p1172_p1 = scmp.lt.u32.totalorder %s1168_s21, %s1407_s1 }
   0x5   :  { %p1174_p2 = pnand %p1172_p1, %p1169_p0 }
   0x7   :  { %1177 = shalt.err (!%p1174_p2)
}
   0x8   :  { %s1178_s26 = scalar_lea.vmem %s26_s18, 6272  ;;  %p1183_p4 = scmp.lt.s32.totalorder %s26_s18, %s26_s18 }
   0x9   :  { %p1179_p3 = scmp.ne.s32.totalorder %s26_s18, %s1178_s26  ;;  %p1184_p5 = scmp.lt.s32.totalorder %s1178_s26, %s1178_s26 }
   0xb   :  { %p1185_p6 = por %p1184_p5, %p1183_p4 }
   0xd   :  { %p1186_p7 = pnand %p1185_p6, %p1179_p3 }
   0xf   :  { %1189 = shalt.err (!%p1186_p7)
}
  0x10   :  { %s1217_s27 = smov 64   ;;  %s1218_s28 = smov 4  }
  0x11   :  { %31 = dma.hbm_to_vmem [thread:$0]  %s1407_s1, 6272, %s26_s18, [#allocation3], %s1217_s27, %s1217_s27, %s1218_s28  }
  0x12   :  { %1212 = dma.done.wait [#allocation3], 6272  }
  0x13   :  { %1213 = vsyncadd [#allocation3], 4294961024  ;;  %v1103_v0 = vld [vmem:[#allocation2 + $0x40] sm:$0xff]   ;;  %v1107_v4 = vld [vmem:[#allocation2 + $0x48] sm:$0xff]   ;;  %v1219_v44 = vmov 0.0   ;;  %vm1220_vm0 = vmmov 0  }
  0x14   :  { %v1104_v1 = vld [vmem:[#allocation2] sm:$0xff]   ;;  %977 = vmatprep.subr.bf16.mxu0 %v1103_v0  ;;  %v1108_v5 = vld [vmem:[#allocation2 + $0x8] sm:$0xff]   ;;  %v1111_v8 = vld [vmem:[#allocation2 + $0x50] sm:$0xff]   ;;  %vm467_vm1 = vcmask 130048   ;;  %vm776_vm2 = vcmask 523264   ;;  %s1221_s14 = smov [#allocation5]  }
  0x15   :  { %v1105_v2 = vld [vmem:[#allocation2 + $0xc0] sm:$0xff]   ;;  %978 = vmatpush3.bf16.msra.mxu0 %v1104_v1  ;;  %v1109_v6 = vld [vmem:[#allocation2 + $0xc8] sm:$0xff]   ;;  %v1112_v9 = vld [vmem:[#allocation2 + $0x10] sm:$0xff]   ;;  %s898_s15 = sshll.u32 %s1221_s14, 4  ;;  %s899_s15 = int_to_ptr.vmem [resolvable:$true] %s898_s15 }
  0x16   :  { %v1106_v3 = vld [vmem:[#allocation2 + $0x80] sm:$0xff]   ;;  %999 = vmatprep.subr.bf16.mxu1 %v1105_v2  ;;  %979 = vmatprep.subr.bf16.mxu0 %v1107_v4  ;;  %v1110_v7 = vld [vmem:[#allocation2 + $0x88] sm:$0xff]   ;;  %v1113_v10 = vld [vmem:[#allocation2 + $0xd0] sm:$0xff]   ;;  %p1195_p9 = scmp.lt.s32.totalorder %s899_s15, %s899_s15 }
  0x17   :  { %1000 = vmatpush3.bf16.msra.mxu1 %v1106_v3  ;;  %v1114_v11 = vld [vmem:[#allocation2 + $0x90] sm:$0xff]   ;;  %v1115_v12 = vld [vmem:[#allocation2 + $0x58] sm:$0xff]   ;;  %v1119_v16 = vld [vmem:[#allocation2 + $0x60] sm:$0xff]  }
  0x18   :  { %1001 = vmatprep.subr.bf16.mxu1 %v1109_v6  ;;  %v1116_v13 = vld [vmem:[#allocation2 + $0x18] sm:$0xff]   ;;  %v1120_v17 = vld [vmem:[#allocation2 + $0x20] sm:$0xff]   ;;  %v1123_v20 = vld [vmem:[#allocation2 + $0x68] sm:$0xff]  }
  0x19   :  { %980 = vmatpush3.bf16.msra.mxu0 %v1108_v5  ;;  %v1117_v14 = vld [vmem:[#allocation2 + $0xd8] sm:$0xff]   ;;  %v1121_v18 = vld [vmem:[#allocation2 + $0xe0] sm:$0xff]   ;;  %v1124_v21 = vld [vmem:[#allocation2 + $0x28] sm:$0xff]  }
  0x1a   :  { %981 = vmatprep.subr.bf16.mxu0 %v1111_v8  ;;  %v1118_v15 = vld [vmem:[#allocation2 + $0x98] sm:$0xff]   ;;  %v1122_v19 = vld [vmem:[#allocation2 + $0xa0] sm:$0xff]   ;;  %v1125_v22 = vld [vmem:[#allocation2 + $0xe8] sm:$0xff]  }
  0x1b   :  { %1002 = vmatpush3.bf16.msra.mxu1 %v1110_v7  ;;  %v1126_v23 = vld [vmem:[#allocation2 + $0xa8] sm:$0xff]   ;;  %v1127_v24 = vld [vmem:[#allocation2 + $0x70] sm:$0xff]   ;;  %v1131_v28 = vld [vmem:[#allocation2 + $0x78] sm:$0xff]  }
  0x1c   :  { %1003 = vmatprep.subr.bf16.mxu1 %v1113_v10  ;;  %v1128_v25 = vld [vmem:[#allocation2 + $0x30] sm:$0xff]   ;;  %v1132_v29 = vld [vmem:[#allocation2 + $0x38] sm:$0xff]   ;;  %v55_v31 = vld [vmem:[%s1406_s0 + $0x8] sm:$0xff] }
  0x1d   :  { %982 = vmatpush3.bf16.msra.mxu0 %v1112_v9  ;;  %v1129_v26 = vld [vmem:[#allocation2 + $0xf0] sm:$0xff]   ;;  %v1133_v30 = vld [vmem:[#allocation2 + $0xf8] sm:$0xff]   ;;  %v62_v32 = vpack.c.bf16 %v55_v31, %v55_v31  ;;  %v54_v34 = vld [vmem:[%s1406_s0] sm:$0xff] }
  0x1e   :  { %983 = vmatprep.subr.bf16.mxu0 %v1115_v12  ;;  %v1130_v27 = vld [vmem:[#allocation2 + $0xb0] sm:$0xff]   ;;  %v1134_v33 = vld [vmem:[#allocation2 + $0xb8] sm:$0xff]   ;;  %v61_v35 = vpack.c.bf16 %v54_v34, %v54_v34  ;;  %v1135_v36 = vld [vmem:[#allocation2 + $0x140] sm:$0xff]  }
  0x1f   :  { %1004 = vmatpush3.bf16.msra.mxu1 %v1114_v11  ;;  %v57_v37 = vld [vmem:[%s1406_s0 + $0x18] sm:$0xff]  ;;  %503 = vmatprep.mubr.bf16.mxu0 %v62_v32  ;;  %v1136_v39 = vld [vmem:[#allocation2 + $0x100] sm:$0xff]   ;;  %v56_v40 = vld [vmem:[%s1406_s0 + $0x10] sm:$0xff] }
  0x20   :  { %1005 = vmatprep.subr.bf16.mxu1 %v1117_v14  ;;  %v64_v38 = vpack.c.bf16 %v57_v37, %v57_v37  ;;  %v63_v41 = vpack.c.bf16 %v56_v40, %v56_v40  ;;  %v1137_v42 = vld [vmem:[#allocation2 + $0x148] sm:$0xff]   ;;  %v1139_v45 = vld [vmem:[#allocation2 + $0x150] sm:$0xff]   ;;  %v1141_v47 = vld [vmem:[#allocation2 + $0x158] sm:$0xff]  }
  0x21   :  { %984 = vmatpush3.bf16.msra.mxu0 %v1116_v13  ;;  %v1138_v43 = vld [vmem:[#allocation2 + $0x108] sm:$0xff]   ;;  %v1140_v46 = vld [vmem:[#allocation2 + $0x110] sm:$0xff]   ;;  %v1142_v48 = vld [vmem:[#allocation2 + $0x118] sm:$0xff]  }
  0x22   :  { %985 = vmatprep.subr.bf16.mxu0 %v1119_v16  ;;  %543 = vmatprep.mubr.bf16.mxu1 %v64_v38  ;;  %v1143_v49 = vld [vmem:[#allocation2 + $0x160] sm:$0xff]   ;;  %v1145_v51 = vld [vmem:[#allocation2 + $0x168] sm:$0xff]   ;;  %v1147_v55 = vld [vmem:[#allocation2 + $0x170] sm:$0xff]  }
  0x23   :  { %1006 = vmatpush3.bf16.msra.mxu1 %v1118_v15  ;;  %v1144_v50 = vld [vmem:[#allocation2 + $0x120] sm:$0xff]   ;;  %v1146_v52 = vld [vmem:[#allocation2 + $0x128] sm:$0xff]   ;;  %v60_v57 = vld [vmem:[%s1406_s0 + $0x30] sm:$0xff] }
  0x24   :  { %1007 = vmatprep.subr.bf16.mxu1 %v1121_v18  ;;  %v1151_v53 = vld [vmem:[#allocation2 + $0x180] sm:$0xff]   ;;  %v59_v54 = vld [vmem:[%s1406_s0 + $0x28] sm:$0xff]  ;;  %v67_v58 = vpack.c.bf16 %v60_v57, %v60_v57  ;;  %v1148_v59 = vld [vmem:[#allocation2 + $0x130] sm:$0xff]  }
  0x25   :  { %986 = vmatpush3.bf16.msra.mxu0 %v1120_v17  ;;  %v66_v56 = vpack.c.bf16 %v59_v54, %v59_v54  ;;  %v1149_v60 = vld [vmem:[#allocation2 + $0x178] sm:$0xff]   ;;  %v58_v62 = vld [vmem:[%s1406_s0 + $0x20] sm:$0xff]  ;;  %v1158_v31 = vld [vmem:[%s1411_s5 + $0x30] sm:$0xff]  }
  0x26   :  { %987 = vmatprep.subr.bf16.mxu0 %v1123_v20  ;;  %v1150_v61 = vld [vmem:[#allocation2 + $0x138] sm:$0xff]   ;;  %v65_v63 = vpack.c.bf16 %v58_v62, %v58_v62  ;;  %v907_v1 = vld [vmem:[%s1408_s2] ss:$0 sm:$0xff]  ;;  %v1162_v62 = vld [vmem:[%s1415_s9 + $0x10] sm:$0xff]  }
  0x27   :  { %1008 = vmatpush3.bf16.msra.mxu1 %v1122_v19  ;;  %v1159_v32 = vld [vmem:[%s1411_s5 + $0x38] sm:$0xff]  }
  0x28   :  { %1009 = vmatprep.subr.bf16.mxu1 %v1125_v22 }
  0x29   :  { %988 = vmatpush3.bf16.msra.mxu0 %v1124_v21 }
  0x2a   :  { %989 = vmatprep.subr.bf16.mxu0 %v1127_v24 }
  0x2b   :  { %1010 = vmatpush3.bf16.msra.mxu1 %v1126_v23 }
  0x2c   :  { %1011 = vmatprep.subr.bf16.mxu1 %v1129_v26  ;;  %v1153_v26 = vld [vmem:[%s1411_s5 + $0x8] sm:$0xff]  }
  0x2d   :  { %990 = vmatpush3.bf16.msra.mxu0 %v1128_v25  ;;  %v1152_v25 = vld [vmem:[%s1411_s5] sm:$0xff]  }
  0x2e   :  { %991 = vmatprep.subr.bf16.mxu0 %v1131_v28  ;;  %v1155_v28 = vld [vmem:[%s1411_s5 + $0x18] sm:$0xff]  }
  0x2f   :  { %1012 = vmatpush3.bf16.msra.mxu1 %v1130_v27  ;;  %v1154_v27 = vld [vmem:[%s1411_s5 + $0x10] sm:$0xff]  }
  0x30   :  { %1013 = vmatprep.subr.bf16.mxu1 %v1133_v30  ;;  %v1157_v30 = vld [vmem:[%s1411_s5 + $0x28] sm:$0xff]  }
  0x31   :  { %992 = vmatpush3.bf16.msra.mxu0 %v1132_v29  ;;  %v1156_v29 = vld [vmem:[%s1411_s5 + $0x20] sm:$0xff]  }
  0x32   :  { %1021 = vmatprep.subr.bf16.mxu0 %v1135_v36 }
  0x33   :  { %1014 = vmatpush3.bf16.msra.mxu1 %v1134_v33 }
  0x34   :  { %504 = vmatmul.mubr.bf16.vlgmr.msra.gmra.mrb[0].mxu0 %v61_v35  ;;  %1059 = vmatprep.subr.bf16.mxu1 %v1219_v44 }
  0x35   :  { %1022 = vmatpush3.bf16.msra.mxu0 %v1136_v39  ;;  %583 = vmatprep.mubr.bf16.mxu0 %v66_v56 }
  0x36   :  { %544 = vmatmul.mubr.bf16.vlgmr.msra.gmra.mrb[0].mxu1 %v63_v41  ;;  %1023 = vmatprep.subr.bf16.mxu0 %v1137_v42 }
  0x37   :  { %1061 = vmatprep.mubr.msk.bf16.mxu1 %vm1220_vm0, %v1219_v44  ;;  %1060 = vmatpush3.bf16.msra.mxu1 %v1151_v53 }
  0x38   :  { %1065 = vmatprep.subr.bf16.mxu1 %v1219_v44 }
  0x39   :  { %1024 = vmatpush3.bf16.msra.mxu0 %v1138_v43  ;;  %v958_v43 = vld [vmem:[%s1409_s3] ss:$0 sm:$0xff] }
  0x3a   :  { %1025 = vmatprep.subr.bf16.mxu0 %v1139_v45 }
  0x3d   :  { %1026 = vmatpush3.bf16.msra.mxu0 %v1140_v46  ;;  %v959_v46 = vld [vmem:[%s1410_s4] ss:$0 sm:$0xff] }
  0x3e   :  { %1027 = vmatprep.subr.bf16.mxu0 %v1141_v47  ;;  %1062 = vmatmul.mubr.msk.bf16.vlgmr.msra.gmra.mrb[4].mxu1 %vm467_vm1, %v67_v58 }
  0x3f   :  { %1081 = vmatprep.mubr.msk.bf16.mxu1 %vm1220_vm0, %v1219_v44  ;;  %1066 = vmatpush3.bf16.msra.mxu1 %v1152_v25 }
  0x40   :  { %1067 = vmatprep.subr.bf16.mxu1 %v1219_v44 }
  0x41   :  { %1028 = vmatpush3.bf16.msra.mxu0 %v1142_v48 }
  0x42   :  { %1029 = vmatprep.subr.bf16.mxu0 %v1143_v49 }
  0x43   :  { %1068 = vmatpush3.bf16.msra.mxu1 %v1153_v26 }
  0x44   :  { %1069 = vmatprep.subr.bf16.mxu1 %v1219_v44 }
  0x45   :  { %1030 = vmatpush3.bf16.msra.mxu0 %v1144_v50 }
  0x46   :  { %1031 = vmatprep.subr.bf16.mxu0 %v1145_v51  ;;  %v960_v51 = vld [vmem:[%s1412_s6] ss:$0 sm:$0xff] }
  0x47   :  { %1070 = vmatpush3.bf16.msra.mxu1 %v1154_v27 }
  0x48   :  { %1071 = vmatprep.subr.bf16.mxu1 %v1219_v44 }
  0x49   :  { %1032 = vmatpush3.bf16.msra.mxu0 %v1146_v52 }
  0x4a   :  { %1033 = vmatprep.subr.bf16.mxu0 %v1147_v55 }
  0x4b   :  { %1072 = vmatpush3.bf16.msra.mxu1 %v1155_v28 }
  0x4c   :  { %1073 = vmatprep.subr.bf16.mxu1 %v1219_v44 }
  0x4d   :  { %1034 = vmatpush3.bf16.msra.mxu0 %v1148_v59 }
  0x4e   :  { %1035 = vmatprep.subr.bf16.mxu0 %v1149_v60  ;;  %v1160_v60 = vld [vmem:[%s1415_s9] sm:$0xff]  }
  0x4f   :  { %1074 = vmatpush3.bf16.msra.mxu1 %v1156_v29 }
  0x50   :  { %1075 = vmatprep.subr.bf16.mxu1 %v1219_v44 }
  0x51   :  { %1036 = vmatpush3.bf16.msra.mxu0 %v1150_v61  ;;  %v1161_v61 = vld [vmem:[%s1415_s9 + $0x8] sm:$0xff]  }
  0x52   :  { %1085 = vmatprep.subr.bf16.mxu0 %v1219_v44 }
  0x53   :  { %1076 = vmatpush3.bf16.msra.mxu1 %v1157_v30 }
  0x54   :  { %584 = vmatmul.mubr.bf16.vlgmr.msra.gmra.mrb[4].mxu0 %v65_v63  ;;  %1077 = vmatprep.subr.bf16.mxu1 %v1219_v44  ;;  %v1163_v63 = vld [vmem:[%s1415_s9 + $0x18] sm:$0xff]  }
  0x55   :  { %1093 = vmatprep.mubr.msk.bf16.mxu0 %vm1220_vm0, %v1219_v44  ;;  %1086 = vmatpush3.bf16.msra.mxu0 %v1160_v60 }
  0x56   :  { %1087 = vmatprep.subr.bf16.mxu0 %v1219_v44 }
  0x57   :  { %1078 = vmatpush3.bf16.msra.mxu1 %v1158_v31 }
  0x58   :  { %1079 = vmatprep.subr.bf16.mxu1 %v1219_v44 }
  0x59   :  { %1088 = vmatpush3.bf16.msra.mxu0 %v1161_v61 }
  0x5a   :  { %1089 = vmatprep.subr.bf16.mxu0 %v1219_v44 }
  0x5b   :  { %1080 = vmatpush3.bf16.msra.mxu1 %v1159_v32 }
  0x5d   :  { %1090 = vmatpush3.bf16.msra.mxu0 %v1162_v62 }
  0x5e   :  { %1091 = vmatprep.subr.bf16.mxu0 %v1219_v44  ;;  %v970_v44 = vld [vmem:[%s1414_s8] ss:$0 sm:$0xff] }
  0x61   :  { %1092 = vmatpush3.bf16.msra.mxu0 %v1163_v63 }
 0x107   :  { %v993_v0 = vpop.f32.mrb[0].mxu0 }
 0x108   :  { %v994_v2 = vpop.f32.mrb[1].mxu0 }
 0x109   :  { %v995_v3 = vadd.f32 %v994_v2, %v993_v0  ;;  %v996_v4 = vpop.f32.mrb[2].mxu0  ;;  %v1015_v5 = vpop.f32.mrb[0].mxu1 }
 0x10a   :  { %v997_v6 = vpop.f32.mrb[3].mxu0  ;;  %v1016_v8 = vpop.f32.mrb[1].mxu1 }
 0x10b   :  { %v506_v7 = vadd.f32 %v995_v3, %v907_v1  ;;  %v1017_v9 = vadd.f32 %v1016_v8, %v1015_v5  ;;  %v1018_v10 = vpop.f32.mrb[2].mxu1 }
 0x10c   :  { %v1019_v11 = vpop.f32.mrb[3].mxu1  ;;  %v969_v10 = vld [vmem:[%s1413_s7] ss:$0 sm:$0xff]  ;;  %s1190_s7 = scalar_lea.vmem %s899_s15, 128 }
 0x10d   :  { %v546_v12 = vadd.f32 %v1017_v9, %v506_v7  ;;  %p1191_p8 = scmp.ne.s32.totalorder %s899_s15, %s1190_s7  ;;  %p1196_p10 = scmp.lt.s32.totalorder %s1190_s7, %s1190_s7 }
 0x10f   :  { %p1197_p11 = por %p1196_p10, %p1195_p9 }
 0x111   :  { %v625_v13 = vpop.f32.mrb[4].mxu1  ;;  %p1198_p12 = pnand %p1197_p11, %p1191_p8 }
 0x112   :  { %v1063_v14 = vpop.f32.mrb[5].mxu1 }
 0x113   :  { %v628_v15 = vpop.f32.mrb[6].mxu1 }
 0x114   :  { %v1064_v16 = vpop.f32.mrb[7].mxu1 }
 0x115   :  { %v971_v16 = vld [vmem:[%s1416_s10] ss:$0 sm:$0xff] }
 0x127   :  { %v1037_v17 = vpop.f32.mrb[4].mxu0 }
 0x128   :  { %v1038_v18 = vpop.f32.mrb[5].mxu0 }
 0x129   :  { %v1039_v19 = vadd.f32 %v1038_v18, %v1037_v17  ;;  %v1040_v20 = vpop.f32.mrb[6].mxu0 }
 0x12a   :  { %v1041_v21 = vpop.f32.mrb[7].mxu0 }
 0x12b   :  { %v586_v22 = vadd.f32 %v1039_v19, %v546_v12 }
 0x12d   :  { %v626_v23 = vadd.f32 %v625_v13, %v586_v22 }
 0x12f   :  { %633 = vadd.xlane.f32.xlu0 %v626_v23  ;;  %v636_v24 = vmul.f32 %v626_v23, %v626_v23 }
 0x133   :  { %637 = vadd.xlane.f32.xlu0 %v636_v24 }
 0x1bc   :  { %v634_v33 = vpop.xlane.xlu0 %633 }
 0x1bd   :  { %v635_v34 = vmul.f32 0.0078125, %v634_v33 }
 0x1bf   :  { %v640_v36 = vmul.f32 %v635_v34, %v635_v34  ;;  %v643_v41 = vsub.f32 %v626_v23, %v635_v34 }
 0x1c0   :  { %v638_v35 = vpop.xlane.xlu0 %637 }
 0x1c1   :  { %v639_v37 = vmul.f32 0.0078125, %v638_v35 }
 0x1c3   :  { %v641_v38 = vsub.f32 %v639_v37, %v640_v36 }
 0x1c5   :  { %v642_v39 = vmax.f32 %v641_v38, 0.0 }
 0x1c7   :  { %v644_v40 = vadd.f32 1e-05, %v642_v39 }
 0x1c9   :  { %1164 = vrsqrt.f32 %v644_v40 }
 0x1d3   :  { %v1165_v42 = vpop.eup %1164 }
 0x1d4   :  { %v646_v45 = vmul.f32 %v1165_v42, %v643_v41 }
 0x1d6   :  { %v653_v47 = vmul.f32 %v958_v43, %v646_v45 }
 0x1d8   :  { %v660_v48 = vadd.f32 %v959_v46, %v653_v47 }
 0x1da   :  { %v661_v49 = vmax.f32 %v660_v48, 0.0 }
 0x1dc   :  { %v662_v50 = vpack.c.bf16 %v661_v49, %v661_v49 }
 0x1de   :  { %1082 = vmatmul.mubr.bf16.vlgmr.msra.gmra.mrb[8].mxu1 %v662_v50 }
 0x2b1   :  { %v768_v52 = vpop.f32.mrb[8].mxu1 }
 0x2b2   :  { %v769_v53 = vadd.f32 %v960_v51, %v768_v52  ;;  %v1083_v54 = vpop.f32.mrb[9].mxu1 }
 0x2b3   :  { %v771_v55 = vpop.f32.mrb[10].mxu1 }
 0x2b4   :  { %v1084_v56 = vpop.f32.mrb[11].mxu1  ;;  %v777_v57 = vsel %vm776_vm2, %v769_v53, 0.0  ;;  %v781_v58 = vmul.f32 %v769_v53, %v769_v53 }
 0x2b5   :  { %778 = vadd.xlane.f32.xlu1 %v777_v57 }
 0x2b6   :  { %v782_v59 = vsel %vm776_vm2, %v781_v58, 0.0 }
 0x2b9   :  { %783 = vadd.xlane.f32.xlu1 %v782_v59 }
 0x342   :  { %v779_v0 = vpop.xlane.xlu1 %778 }
 0x343   :  { %v780_v1 = vmul.f32 0.015625, %v779_v0 }
 0x345   :  { %v786_v3 = vmul.f32 %v780_v1, %v780_v1  ;;  %v789_v8 = vsub.f32 %v769_v53, %v780_v1 }
 0x346   :  { %v784_v2 = vpop.xlane.xlu1 %783 }
 0x347   :  { %v785_v4 = vmul.f32 0.015625, %v784_v2 }
 0x349   :  { %v787_v5 = vsub.f32 %v785_v4, %v786_v3 }
 0x34b   :  { %v788_v6 = vmax.f32 %v787_v5, 0.0 }
 0x34d   :  { %v790_v7 = vadd.f32 1e-05, %v788_v6 }
 0x34f   :  { %1166 = vrsqrt.f32 %v790_v7 }
 0x359   :  { %v1167_v9 = vpop.eup %1166 }
 0x35a   :  { %v792_v11 = vmul.f32 %v1167_v9, %v789_v8 }
 0x35c   :  { %v799_v12 = vmul.f32 %v969_v10, %v792_v11 }
 0x35e   :  { %v806_v13 = vadd.f32 %v970_v44, %v799_v12 }
 0x360   :  { %v807_v14 = vmax.f32 %v806_v13, 0.0 }
 0x362   :  { %v808_v15 = vpack.c.bf16 %v807_v14, %v807_v14 }
 0x364   :  { %1094 = vmatmul.mubr.msk.bf16.vlgmr.msra.gmra.mrb[8].mxu0 %vm776_vm2, %v808_v15 }
 0x437   :  { %v885_v17 = vpop.f32.mrb[8].mxu0 }
 0x438   :  { %v886_v18 = vadd.f32 %v971_v16, %v885_v17  ;;  %v1095_v19 = vpop.f32.mrb[9].mxu0 }
 0x439   :  { %v888_v20 = vpop.f32.mrb[10].mxu0 }
 0x43a   :  { %891 = vst [vmem:[#allocation5] sm:$0xff] %v886_v18  ;;  %v1096_v21 = vpop.f32.mrb[11].mxu0 }
 0x43b   :  { %1201 = shalt.err (!%p1198_p12)
}
 0x43c   :  { %s1202_s10 = scalar_lea.hbm %s1417_s11, 128 }
 0x43d   :  { %p1203_p13 = scmp.ne.s32.totalorder %s1417_s11, %s1202_s10  ;;  %p1206_p0 = scmp.lt.u32.totalorder %s1202_s10, %s1417_s11 }
 0x43f   :  { %p1208_p1 = pnand %p1206_p0, %p1203_p13 }
 0x441   :  { %1211 = shalt.err (!%p1208_p1)
}
 0x442   :  { %901 = dma.vmem_to_hbm [thread:$0]  %s899_s15, 128, %s1417_s11, [#allocation4]  }
 0x443   :  { %1214 = dma.done.wait [#allocation4], 128  }
 0x444   :  { %1215 = vsyncadd [#allocation4], 4294967168 }
 0x445   :  { %905 = vsyncpa [#allocation3], 1 }
 0x446   :  { %906 = vsyncpa [#allocation4], 1 }

</bundles_post_ra>
